<compile_context>
chip_gen: v5e
topology: v5e:2x2
jax: 0.10.0
libtpu: 0.0.40
codegen_flags: <defaults>
</compile_context>

<pallas_src>
import functools

import jax
import jax.numpy as jnp
from jax.experimental import pallas as pl
from jax.experimental.pallas import tpu as pltpu


def _soft_target_kernel(s_ref, t_ref, o_ref, *, inv_temp: float):
    """One batch tile: sum over rows of KL(softmax(t/T) || softmax(s/T))."""
    inv_t = jnp.float32(inv_temp)
    s = s_ref[...].astype(jnp.float32) * inv_t          # (TB, C) student logits / T
    t = t_ref[...].astype(jnp.float32) * inv_t          # (TB, C) teacher logits / T

    s_shift = s - jnp.max(s, axis=-1, keepdims=True)
    t_shift = t - jnp.max(t, axis=-1, keepdims=True)

    exp_t = jnp.exp(t_shift)                            # only two full-size exps
    exp_s = jnp.exp(s_shift)
    z_t = jnp.sum(exp_t, axis=-1, keepdims=True)        # (TB, 1)
    z_s = jnp.sum(exp_s, axis=-1, keepdims=True)        # (TB, 1)

    # sum_j p_t * (log p_t - log p_s)
    #   = (1/z_t) * sum_j exp_t_j*(t_shift_j - s_shift_j) + log z_s - log z_t
    cross = jnp.sum(exp_t * (t_shift - s_shift), axis=-1, keepdims=True)
    # Per-row reciprocal/logs only (TB values) -> off the per-element hot path;
    # exact reciprocal keeps the result close to the XLA reference.
    kl_row = cross * pl.reciprocal(z_t) + jnp.log(z_s) - jnp.log(z_t)    # (TB, 1)

    # One partial per grid step, written as a full lane-dense (1,8,128) block
    # (unmasked vector store); wrapper reads element [i, 0, 0].
    partial = jnp.sum(kl_row)
    o_ref[...] = partial + jnp.zeros((1, 8, 128), jnp.float32)


def _round_up(x: int, m: int) -> int:
    return ((x + m - 1) // m) * m


def soft_target_loss(out_s: jax.Array, out_t: jax.Array, T: float) -> jax.Array:
    """Pallas implementation of SoftTarget(T)(out_s, out_t) for [B, C] logits."""
    assert out_s.shape == out_t.shape and out_s.ndim == 2
    B, C = out_s.shape
    bytes_el = jnp.dtype(out_s.dtype).itemsize

    # Batch tile: keep each (TB, C) f32 temporary around ~2 MiB so the
    # double-buffered inputs + in-kernel temporaries stay well under the
    # smallest VMEM (v7x: 64 MiB physical / 32 MiB scoped default).
    tb = (2 * 1024 * 1024) // max(1, C * 4)
    tb = max(8, min(1024, (tb // 8) * 8))
    tb = min(tb, _round_up(B, 8))

    # Zero-pad ragged batches: zero student+teacher rows give exactly 0 KL.
    b_pad = _round_up(B, tb)
    if b_pad != B:
        out_s = jnp.pad(out_s, ((0, b_pad - B), (0, 0)))
        out_t = jnp.pad(out_t, ((0, b_pad - B), (0, 0)))
    grid_b = b_pad // tb

    # TODO(synk): for very large C (LLM vocab >= 64k) also tile the class axis
    # with an online / two-pass logsumexp instead of one (TB, C) block per step.

    kernel = functools.partial(_soft_target_kernel, inv_temp=1.0 / float(T))
    partials = pl.pallas_call(
        kernel,
        out_shape=jax.ShapeDtypeStruct((grid_b, 8, 128), jnp.float32),
        grid_spec=pltpu.PrefetchScalarGridSpec(
            num_scalar_prefetch=0,
            grid=(grid_b,),
            in_specs=[
                pl.BlockSpec((tb, C), lambda i: (i, 0)),
                pl.BlockSpec((tb, C), lambda i: (i, 0)),
            ],
            out_specs=pl.BlockSpec((1, 8, 128), lambda i: (i, 0, 0)),
        ),
        compiler_params=pltpu.CompilerParams(
            dimension_semantics=("parallel",),   # v7x: shard steps across both TCs
            vmem_limit_bytes=32 * 1024 * 1024,
        ),
        cost_estimate=pl.CostEstimate(
            flops=8 * b_pad * C,
            transcendentals=2 * b_pad * C,
            bytes_accessed=2 * b_pad * C * bytes_el + grid_b * 8 * 128 * 4,
        ),
    )(out_s, out_t)

    # Cheap epilogue: sum block partials, batchmean over the *global* B, *T*T.
    total = jnp.sum(partials[:, 0, 0])
    return (total / jnp.float32(B)) * jnp.float32(T) * jnp.float32(T)


def _reference(out_s, out_t, T):
    s = out_s.astype(jnp.float32) / T
    t = out_t.astype(jnp.float32) / T
    log_p_s = jax.nn.log_softmax(s, axis=1)
    p_t = jax.nn.softmax(t, axis=1)
    log_p_t = jax.nn.log_softmax(t, axis=1)
    return (jnp.sum(p_t * (log_p_t - log_p_s)) / out_s.shape[0]) * T * T


if __name__ == "__main__":
    key = jax.random.PRNGKey(0)
    T = 4.0

    # Case 1: small [batch, classes] f32 logits (matches the PyTorch module).
    k1, k2, k3, k4 = jax.random.split(key, 4)
    s1 = jax.random.normal(k1, (4, 16), dtype=jnp.float32)
    t1 = jax.random.normal(k2, (4, 16), dtype=jnp.float32)
    loss1 = soft_target_loss(s1, t1, T)
    jax.block_until_ready(loss1)
    ref1 = _reference(s1, t1, T)
    assert jnp.allclose(loss1, ref1, rtol=1e-4, atol=2e-5), (loss1, ref1)

    # Case 2: ragged batch + bf16 logits (exercises zero-padding and the
    # 2-byte-per-element HBM DMA path).
    s2 = (jax.random.normal(k3, (37, 160), dtype=jnp.float32) * 3.0).astype(jnp.bfloat16)
    t2 = (jax.random.normal(k4, (37, 160), dtype=jnp.float32) * 3.0).astype(jnp.bfloat16)
    loss2 = soft_target_loss(s2, t2, T)
    jax.block_until_ready(loss2)
    ref2 = _reference(s2, t2, T)
    assert jnp.allclose(loss2, ref2, rtol=1e-4, atol=1e-4), (loss2, ref2)

    print("KERNEL_OK")
</pallas_src>

<mosaic_0001>
module attributes {stable_mosaic.version = 11 : i64} {
  func.func @_soft_target_kernel(%arg0: i32, %arg1: memref<8x16xf32, #tpu.memory_space<vmem>>, %arg2: memref<8x16xf32, #tpu.memory_space<vmem>>, %arg3: memref<1x8x128xf32, #tpu.memory_space<vmem>>) attributes {dimension_semantics = [#tpu.dimension_semantics<parallel>], iteration_bounds = array<i64: 1>, scalar_prefetch = 0 : i64, scratch_operands = 0 : i64, tpu.core_type = #tpu.core_type<tc>, window_params = [{transform_indices = @transform_0, window_bounds = array<i64: 8, 16>}, {transform_indices = @transform_1, window_bounds = array<i64: 8, 16>}, {transform_indices = @transform_2, window_bounds = array<i64: 1, 8, 128>}]} {
    %c0 = arith.constant 0 : index
    %c0_0 = arith.constant 0 : index
    %0 = vector.load %arg1[%c0, %c0_0] : memref<8x16xf32, #tpu.memory_space<vmem>>, vector<8x16xf32>
    %cst = arith.constant 2.500000e-01 : f32
    %1 = vector.broadcast %cst : f32 to vector<8x16xf32>
    %2 = arith.mulf %0, %1 : vector<8x16xf32>
    %c0_1 = arith.constant 0 : index
    %c0_2 = arith.constant 0 : index
    %3 = vector.load %arg2[%c0_1, %c0_2] : memref<8x16xf32, #tpu.memory_space<vmem>>, vector<8x16xf32>
    %cst_3 = arith.constant 2.500000e-01 : f32
    %4 = vector.broadcast %cst_3 : f32 to vector<8x16xf32>
    %5 = arith.mulf %3, %4 : vector<8x16xf32>
    %cst_4 = arith.constant dense<0xFF800000> : vector<8xf32>
    %6 = vector.multi_reduction <maximumf>, %2, %cst_4 [1] : vector<8x16xf32> to vector<8xf32>
    %7 = vector.shape_cast %6 : vector<8xf32> to vector<8x1xf32>
    %8 = vector.broadcast %7 : vector<8x1xf32> to vector<8x16xf32>
    %9 = arith.subf %2, %8 : vector<8x16xf32>
    %cst_5 = arith.constant dense<0xFF800000> : vector<8xf32>
    %10 = vector.multi_reduction <maximumf>, %5, %cst_5 [1] : vector<8x16xf32> to vector<8xf32>
    %11 = vector.shape_cast %10 : vector<8xf32> to vector<8x1xf32>
    %12 = vector.broadcast %11 : vector<8x1xf32> to vector<8x16xf32>
    %13 = arith.subf %5, %12 : vector<8x16xf32>
    %14 = math.exp %13 : vector<8x16xf32>
    %15 = math.exp %9 : vector<8x16xf32>
    %cst_6 = arith.constant dense<0.000000e+00> : vector<8xf32>
    %16 = vector.multi_reduction <add>, %14, %cst_6 [1] : vector<8x16xf32> to vector<8xf32>
    %17 = vector.shape_cast %16 : vector<8xf32> to vector<8x1xf32>
    %cst_7 = arith.constant dense<0.000000e+00> : vector<8xf32>
    %18 = vector.multi_reduction <add>, %15, %cst_7 [1] : vector<8x16xf32> to vector<8xf32>
    %19 = vector.shape_cast %18 : vector<8xf32> to vector<8x1xf32>
    %20 = arith.subf %13, %9 : vector<8x16xf32>
    %21 = arith.mulf %14, %20 : vector<8x16xf32>
    %cst_8 = arith.constant dense<0.000000e+00> : vector<8xf32>
    %22 = vector.multi_reduction <add>, %21, %cst_8 [1] : vector<8x16xf32> to vector<8xf32>
    %23 = vector.shape_cast %22 : vector<8xf32> to vector<8x1xf32>
    %24 = tpu.reciprocal %17 : vector<8x1xf32> -> vector<8x1xf32>
    %25 = arith.mulf %23, %24 : vector<8x1xf32>
    %26 = math.log %19 : vector<8x1xf32>
    %27 = arith.addf %25, %26 : vector<8x1xf32>
    %28 = math.log %17 : vector<8x1xf32>
    %29 = arith.subf %27, %28 : vector<8x1xf32>
    %30 = vector.shape_cast %29 : vector<8x1xf32> to vector<1x8x1xf32>
    %cst_9 = arith.constant dense<0.000000e+00> : vector<1xf32>
    %31 = vector.multi_reduction <add>, %30, %cst_9 [1, 2] : vector<1x8x1xf32> to vector<1xf32>
    %32 = vector.shape_cast %31 : vector<1xf32> to vector<1x1x1xf32>
    %33 = vector.extract %32[0, 0, 0] : f32 from vector<1x1x1xf32>
    %cst_10 = arith.constant 0.000000e+00 : f32
    %34 = vector.broadcast %cst_10 : f32 to vector<1x8x128xf32>
    %35 = vector.broadcast %33 : f32 to vector<1x8x128xf32>
    %36 = arith.addf %35, %34 : vector<1x8x128xf32>
    %c0_11 = arith.constant 0 : index
    %c0_12 = arith.constant 0 : index
    %c0_13 = arith.constant 0 : index
    %37 = vector.load %arg3[%c0_11, %c0_12, %c0_13] : memref<1x8x128xf32, #tpu.memory_space<vmem>>, vector<1x8x128xf32>
    tpu.vector_store %arg3[%c0_11, %c0_12, %c0_13], %36 {strides = array<i32>} : memref<1x8x128xf32, #tpu.memory_space<vmem>>, vector<1x8x128xf32>,
    return
  }
  func.func @transform_0(%arg0: i32) -> (i32, i32) {
    %c0_i32 = arith.constant 0 : i32
    %c0_i32_0 = arith.constant 0 : i32
    return %arg0, %c0_i32 : i32, i32
  }
  func.func @transform_1(%arg0: i32) -> (i32, i32) {
    %c0_i32 = arith.constant 0 : i32
    %c0_i32_0 = arith.constant 0 : i32
    return %arg0, %c0_i32 : i32, i32
  }
  func.func @transform_2(%arg0: i32) -> (i32, i32, i32) {
    %c0_i32 = arith.constant 0 : i32
    %c0_i32_0 = arith.constant 0 : i32
    %c0_i32_1 = arith.constant 0 : i32
    return %arg0, %c0_i32, %c0_i32_0 : i32, i32, i32
  }
}

</mosaic_0001>

<bundles_post_ra>
// kernel: tpu_custom_call.1
= control target key start
LH: loop header
LB: loop body
LE: loop exit
PB: predicated region body
PF: predicated region fallthrough
CT: control target
= control target key end

     0   :  { %7 = vsyncpa [#allocation3], 0  ;;  %s246_s0 = inlined_call_operand.hbm [shape: f32[8,16], index: 0, kind: input, shape index: {}]   ;;  %s247_s1 = inlined_call_operand.hbm [shape: f32[8,16], index: 1, kind: input, shape index: {}]   ;;  %s248_s2 = inlined_call_operand.hbm [shape: f32[1,8,128], index: 2, kind: output, shape index: {}]  }
   0x1   :  { %8 = vsyncpa [#allocation6], 0 }
   0x2   :  { %9 = vsyncpa [#allocation4], 0  ;;  %s15_s11 = sshll.u32 %s246_s0, 4  ;;  %s214_s12 = smov [#allocation2]   ;;  %s16_s11 = int_to_ptr.hbm [resolvable:$true] %s15_s11 }
   0x3   :  { %s17_s13 = sshll.u32 %s214_s12, 4  ;;  %s26_s16 = sshll.u32 %s247_s1, 4  ;;  %s18_s13 = int_to_ptr.vmem [resolvable:$true] %s17_s13  ;;  %s27_s16 = int_to_ptr.hbm [resolvable:$true] %s26_s16 }
   0x4   :  { %20 = dma.hbm_to_vmem [thread:$0]  %s16_s11, 128, %s18_s13, [#allocation3]  }
   0x5   :  { %s215_s17 = smov [#allocation5]  }
   0x6   :  { %s28_s18 = sshll.u32 %s215_s17, 4  ;;  %s29_s18 = int_to_ptr.vmem [resolvable:$true] %s28_s18 }
   0x7   :  { %31 = dma.hbm_to_vmem [thread:$0]  %s27_s16, 128, %s29_s18, [#allocation6]  }
   0x8   :  { %208 = dma.done.wait [#allocation3], 128  }
   0x9   :  { %209 = vsyncadd [#allocation3], 4294967168 }
   0xa   :  { %210 = dma.done.wait [#allocation6], 128  }
   0xb   :  { %211 = vsyncadd [#allocation6], 4294967168  ;;  %v42_v0 = vld [vmem:[#allocation5] sm:$0xff]  ;;  %vm44_vm0 = vcmask 130048   ;;  %v40_v2 = vld [vmem:[#allocation2] sm:$0xff]  ;;  %vm89_vm5 = vcmask 7168  }
   0xc   :  { %v43_v1 = vmul.f32 0.25, %v42_v0  ;;  %v41_v4 = vmul.f32 0.25, %v40_v2  ;;  %s216_s0 = smov [#allocation7]   ;;  %s110_s21 = sshll.u32 %s248_s2, 4  ;;  %s111_s21 = int_to_ptr.hbm [resolvable:$true] %s110_s21 }
   0xd   :  { %s108_s1 = sshll.u32 %s216_s0, 4  ;;  %s109_s1 = int_to_ptr.vmem [resolvable:$true] %s108_s1 }
   0xe   :  { %v49_v3 = vsel %vm44_vm0, %v43_v1, -inf  ;;  %v45_v5 = vsel %vm44_vm0, %v41_v4, -inf }
   0xf   :  { %50 = vmax.xlane.f32.xlu0 %v49_v3 }
  0x17   :  { %46 = vmax.xlane.f32.xlu0 %v45_v5 }
  0x82   :  { %v51_v6 = vpop.xlane.xlu0 %50 }
  0x83   :  { %v52_v7 = vsub.f32 %v43_v1, %v51_v6 }
  0x85   :  { %v53_v8 = vmul.f32 1.442695, %v52_v7 }
  0x87   :  { %126 = vpow2.f32 %v53_v8 }
  0x8a   :  { %v47_v9 = vpop.xlane.xlu0 %46 }
  0x8b   :  { %v48_v10 = vsub.f32 %v41_v4, %v47_v9 }
  0x8d   :  { %v127_v11 = vpop.eup %126  ;;  %v55_v12 = vmul.f32 1.442695, %v48_v10  ;;  %v63_v13 = vsub.f32 %v52_v7, %v48_v10 }
  0x8e   :  { %v57_v14 = vsel %vm44_vm0, %v127_v11, 0.0 }
  0x8f   :  { %128 = vpow2.f32 %v55_v12  ;;  %58 = vadd.xlane.f32.xlu1 %v57_v14  ;;  %v64_v15 = vmul.f32 %v127_v11, %v63_v13 }
  0x91   :  { %v65_v16 = vsel %vm44_vm0, %v64_v15, 0.0 }
  0x92   :  { %66 = vadd.xlane.f32.xlu2 %v65_v16 }
  0x95   :  { %v129_v17 = vpop.eup %128 }
  0x96   :  { %v60_v18 = vsel %vm44_vm0, %v129_v17, 0.0 }
  0x97   :  { %61 = vadd.xlane.f32.xlu1 %v60_v18 }
 0x102   :  { %v59_v19 = vpop.xlane.xlu1 %58 }
 0x103   :  { %130 = vrcp.f32 %v59_v19  ;;  %v79_v24 = vand.u32 2147483648, %v59_v19  ;;  %v77_v26 = vand.u32 2147483647, %v59_v19  ;;  %vm73_vm2 = vweird.f32 %v59_v19 }
 0x105   :  { %v80_v29 = vor.u32 1.1754944e-38, %v79_v24  ;;  %vm78_vm4 = vcmp.eq.f32.partialorder %v77_v26, 8.507059e+37  ;;  %v67_v34 = vpop.xlane.xlu2 %66 }
 0x109   :  { %v131_v20 = vpop.eup %130 }
 0x10a   :  { %v69_v21 = vmul.f32 %v131_v20, %v59_v19  ;;  %v62_v22 = vpop.xlane.xlu1 %61  ;;  %vm74_vm1 = vweird.f32 %v131_v20 }
 0x10b   :  { %132 = vlog2.f32 %v62_v22  ;;  %vm75_vm3 = vmor %vm73_vm2, %vm74_vm1 }
 0x10c   :  { %v70_v23 = vsub.f32 1.0, %v69_v21  ;;  %134 = vlog2.f32 %v59_v19 }
 0x10e   :  { %v71_v25 = vmul.f32 %v131_v20, %v70_v23 }
 0x110   :  { %v72_v27 = vadd.f32 %v131_v20, %v71_v25 }
 0x111   :  { %v133_v28 = vpop.eup %132 }
 0x112   :  { %v76_v30 = vsel %vm75_vm3, %v131_v20, %v72_v27  ;;  %v84_v31 = vmul.f32 0.6931472, %v133_v28  ;;  %v135_v32 = vpop.eup %134 }
 0x113   :  { %v81_v33 = vsel %vm78_vm4, %v80_v29, %v76_v30  ;;  %v87_v37 = vmul.f32 0.6931472, %v135_v32 }
 0x114   :  { %v82_v35 = vmul.f32 %v81_v33, %v67_v34 }
 0x116   :  { %v85_v36 = vadd.f32 %v84_v31, %v82_v35 }
 0x118   :  { %v88_v38 = vsub.f32 %v85_v36, %v87_v37 }
 0x11a   :  { %v90_v39 = vsel %vm89_vm5, %v88_v38, 0.0 }
 0x11b   :  { %91 = vadd.xlane.f32.xlu2 %v90_v39 }
 0x18e   :  { %v92_v40 = vpop.xlane.xlu2 %91 }
 0x18f   :  { %v93_v41 = vrot.slane %v92_v40, 4 }
 0x191   :  { %v94_v42 = vadd.f32 %v93_v41, %v92_v40 }
 0x193   :  { %v95_v43 = vrot.slane %v94_v42, 2 }
 0x195   :  { %v96_v44 = vadd.f32 %v95_v43, %v94_v42 }
 0x197   :  { %v97_v45 = vrot.slane %v96_v44, 1 }
 0x199   :  { %v98_v46 = vadd.f32 %v97_v45, %v96_v44 }
 0x19b   :  { %121 = vpush %v98_v46 }
 0x1cc   :  { %s122_s22 = spop %121 }
 0x1cd   :  { %v100_v47 = vstv %s122_s22 }
 0x1ce   :  { %102 = vst [vmem:[#allocation7] sm:$0xff] %v100_v47 }
 0x1cf   :  { %113 = dma.vmem_to_hbm [thread:$0]  %s109_s1, 128, %s111_s21, [#allocation4]  }
 0x1d0   :  { %212 = dma.done.wait [#allocation4], 128  }
 0x1d1   :  { %213 = vsyncadd [#allocation4], 4294967168 }
 0x1d2   :  { %118 = vsyncpa [#allocation3], 1 }
 0x1d3   :  { %119 = vsyncpa [#allocation6], 1 }
 0x1d4   :  { %120 = vsyncpa [#allocation4], 1 }

</bundles_post_ra>
